<compile_context>
chip_gen: v5e
topology: v5e:2x2
jax: 0.10.0
libtpu: 0.0.40
codegen_flags: <defaults>
</compile_context>

<pallas_src>
import functools

import jax
import jax.numpy as jnp
from jax.experimental import pallas as pl
from jax.experimental.pallas import tpu as pltpu


def _round_up(n, m):
    return ((n + m - 1) // m) * m


def _pad_to(x, rows, cols):
    r, c = x.shape
    return jnp.pad(x, ((0, rows - r), (0, cols - c)))


def _policy_kernel(x_ref, w1_ref, b1_ref, w2_ref, b2_ref, wm_ref, bm_ref,
                   scale_ref, bias_ref, out_ref, *, num_actions):
    """One batch tile: two ReLU layers + tanh head, all three matmuls on the MXU."""
    wdt = w1_ref.dtype
    x = x_ref[...].astype(wdt)
    h1 = jnp.dot(x, w1_ref[...], preferred_element_type=jnp.float32) + b1_ref[...]
    h1 = jnp.maximum(h1, 0.0).astype(wdt)
    h2 = jnp.dot(h1, w2_ref[...], preferred_element_type=jnp.float32) + b2_ref[...]
    h2 = jnp.maximum(h2, 0.0).astype(wdt)
    # Keep the tanh input in f32 (accumulator dtype) even when weights are bf16.
    m = jnp.dot(h2, wm_ref[...], preferred_element_type=jnp.float32) + bm_ref[...]
    act = jnp.tanh(m) * scale_ref[...] + bias_ref[...]
    # Slice the padded lane dim down to the real action count before storing,
    # so only (TB, num_actions) goes back to HBM.
    out_ref[...] = act[:, :num_actions].astype(out_ref.dtype)


def prepare_policy_params(params, action_scale=1.0, action_bias=0.0,
                          param_dtype=jnp.float32):
    """Pad + cast the network parameters once; cache and reuse the result.

    params: dict with w1:(I,H), b1:(H,), w2:(H,H), b2:(H,), wm:(H,A), bm:(A,)
            (weights stored as (in, out), i.e. PyTorch weight transposed).
    action_scale / action_bias: Python scalar or (A,) vector.
    """
    num_inputs, hidden = params["w1"].shape
    num_actions = params["wm"].shape[1]
    Ip = _round_up(num_inputs, 128)
    Hp = _round_up(hidden, 128)
    Ap = _round_up(num_actions, 128)

    scale = jnp.broadcast_to(jnp.asarray(action_scale, jnp.float32),
                             (num_actions,)).reshape(1, -1)
    bias = jnp.broadcast_to(jnp.asarray(action_bias, jnp.float32),
                            (num_actions,)).reshape(1, -1)

    padded = {
        # Zero padding keeps the math exact: padded weight rows/cols and biases
        # contribute nothing, and padded lanes are sliced off in-kernel.
        "w1": _pad_to(params["w1"].astype(param_dtype), Ip, Hp),
        "b1": _pad_to(params["b1"].reshape(1, -1).astype(jnp.float32), 1, Hp),
        "w2": _pad_to(params["w2"].astype(param_dtype), Hp, Hp),
        "b2": _pad_to(params["b2"].reshape(1, -1).astype(jnp.float32), 1, Hp),
        "wm": _pad_to(params["wm"].astype(param_dtype), Hp, Ap),
        "bm": _pad_to(params["bm"].reshape(1, -1).astype(jnp.float32), 1, Ap),
        "scale": _pad_to(scale, 1, Ap),
        "bias": _pad_to(bias, 1, Ap),
    }
    dims = dict(num_inputs=num_inputs, hidden=hidden, num_actions=num_actions,
                Ip=Ip, Hp=Hp, Ap=Ap)
    return padded, dims


@functools.partial(jax.jit,
                   static_argnames=("num_inputs", "hidden", "num_actions",
                                    "Ip", "Hp", "Ap", "block_b"))
def _forward_impl(state, padded, *, num_inputs, hidden, num_actions,
                  Ip, Hp, Ap, block_b):
    B = state.shape[0]
    TB = min(block_b, _round_up(B, 8))     # batch tile (multiple of 8 sublanes)
    Bp = _round_up(B, TB)

    x = state.astype(jnp.float32)
    if (Bp, Ip) != (B, num_inputs):
        x = jnp.pad(x, ((0, Bp - B), (0, Ip - num_inputs)))

    resident = lambda i: (0, 0)     # weights/biases/scale stay VMEM-resident
    batch_tile = lambda i: (i, 0)   # x / out stream with the batch grid

    kernel = functools.partial(_policy_kernel, num_actions=num_actions)
    cost = pl.CostEstimate(
        flops=2 * Bp * (Ip * Hp + Hp * Hp + Hp * Ap),
        transcendentals=Bp * Ap,
        bytes_accessed=4 * (Bp * Ip + Ip * Hp + Hp * Hp + Hp * Ap
                            + 3 * Hp + 3 * Ap + Bp * num_actions),
    )

    out = pl.pallas_call(
        kernel,
        out_shape=jax.ShapeDtypeStruct((Bp, num_actions), jnp.float32),
        grid=(Bp // TB,),
        in_specs=[
            pl.BlockSpec((TB, Ip), batch_tile),   # x
            pl.BlockSpec((Ip, Hp), resident),     # w1
            pl.BlockSpec((1, Hp), resident),      # b1
            pl.BlockSpec((Hp, Hp), resident),     # w2
            pl.BlockSpec((1, Hp), resident),      # b2
            pl.BlockSpec((Hp, Ap), resident),     # wm
            pl.BlockSpec((1, Ap), resident),      # bm
            pl.BlockSpec((1, Ap), resident),      # action_scale
            pl.BlockSpec((1, Ap), resident),      # action_bias
        ],
        out_specs=pl.BlockSpec((TB, num_actions), batch_tile),
        compiler_params=pltpu.CompilerParams(
            dimension_semantics=("parallel",)),
        cost_estimate=cost,
    )(x, padded["w1"], padded["b1"], padded["w2"], padded["b2"],
      padded["wm"], padded["bm"], padded["scale"], padded["bias"])

    return out if Bp == B else out[:B]


def deterministic_policy_forward(state, prepared, block_b=512):
    """state: (B, num_inputs) f32. Returns mean: (B, num_actions) f32."""
    padded, dims = prepared
    return _forward_impl(state, padded, block_b=block_b, **dims)


def init_params(key, num_inputs, num_actions, hidden_dim):
    """xavier_uniform weights (gain=1), zero biases (weights_init_ path,
    i.e. default_init=False)."""
    def xavier(k, fan_in, fan_out):
        limit = jnp.sqrt(6.0 / (fan_in + fan_out))
        # stored as (in, out) == PyTorch weight (out, in) transposed
        return jax.random.uniform(k, (fan_in, fan_out), jnp.float32,
                                  minval=-limit, maxval=limit)

    k1, k2, k3 = jax.random.split(key, 3)
    return {
        "w1": xavier(k1, num_inputs, hidden_dim),
        "b1": jnp.zeros((hidden_dim,), jnp.float32),
        "w2": xavier(k2, hidden_dim, hidden_dim),
        "b2": jnp.zeros((hidden_dim,), jnp.float32),
        "wm": xavier(k3, hidden_dim, num_actions),
        "bm": jnp.zeros((num_actions,), jnp.float32),
    }


def _reference_forward(state, params, action_scale=1.0, action_bias=0.0):
    h1 = jnp.maximum(state @ params["w1"] + params["b1"], 0.0)
    h2 = jnp.maximum(h1 @ params["w2"] + params["b2"], 0.0)
    return jnp.tanh(h2 @ params["wm"] + params["bm"]) * action_scale + action_bias


if __name__ == "__main__":
    # Small shapes implied by the module: state=(batch, num_inputs)
    batch, num_inputs, num_actions, hidden_dim = 2, 16, 4, 32

    key = jax.random.PRNGKey(0)
    k_state, k_params, k_state2 = jax.random.split(key, 3)
    state = jax.random.normal(k_state, (batch, num_inputs), jnp.float32)
    params = init_params(k_params, num_inputs, num_actions, hidden_dim)

    # --- primary test: action_space=None => scale=1.0, bias=0.0 -------------
    prepared = prepare_policy_params(params)          # padded once, reused
    mean = deterministic_policy_forward(state, prepared)
    mean = jax.block_until_ready(mean)
    ref = _reference_forward(state, params)
    assert mean.shape == (batch, num_actions)
    assert jnp.allclose(mean, ref, atol=1e-5, rtol=1e-5), "mismatch vs reference"

    # --- secondary test: per-action scale/bias, multi-tile batch grid -------
    a_scale = jnp.array([0.5, 2.0, 1.5, 3.0], jnp.float32)
    a_bias = jnp.array([0.1, -0.2, 0.0, 0.3], jnp.float32)
    prepared_v = prepare_policy_params(params, a_scale, a_bias)
    state2 = jax.random.normal(k_state2, (50, num_inputs), jnp.float32)
    mean2 = deterministic_policy_forward(state2, prepared_v, block_b=16)
    mean2 = jax.block_until_ready(mean2)
    ref2 = _reference_forward(state2, params, a_scale, a_bias)
    assert mean2.shape == (50, num_actions)
    assert jnp.allclose(mean2, ref2, atol=1e-5, rtol=1e-5), "mismatch (vector scale/bias)"

    # TODO(synk): sample() uses stateful torch Normal noise; forward() (the hot
    # path) is fully in the kernel, noise sampling is left to host-side jax.random.
    print("KERNEL_OK")
</pallas_src>

<mosaic_0001>
module attributes {stable_mosaic.version = 11 : i64} {
  func.func @_policy_kernel(%arg0: i32, %arg1: memref<8x128xf32, #tpu.memory_space<vmem>>, %arg2: memref<128x128xf32, #tpu.memory_space<vmem>>, %arg3: memref<1x128xf32, #tpu.memory_space<vmem>>, %arg4: memref<128x128xf32, #tpu.memory_space<vmem>>, %arg5: memref<1x128xf32, #tpu.memory_space<vmem>>, %arg6: memref<128x128xf32, #tpu.memory_space<vmem>>, %arg7: memref<1x128xf32, #tpu.memory_space<vmem>>, %arg8: memref<1x128xf32, #tpu.memory_space<vmem>>, %arg9: memref<1x128xf32, #tpu.memory_space<vmem>>, %arg10: memref<8x4xf32, #tpu.memory_space<vmem>>) attributes {dimension_semantics = [#tpu.dimension_semantics<parallel>], iteration_bounds = array<i64: 1>, scalar_prefetch = 0 : i64, scratch_operands = 0 : i64, tpu.core_type = #tpu.core_type<tc>, window_params = [{transform_indices = @transform_0, window_bounds = array<i64: 8, 128>}, {pipeline_mode = #tpu.pipeline_mode<synchronous>, transform_indices = @transform_1, window_bounds = array<i64: 128, 128>}, {pipeline_mode = #tpu.pipeline_mode<synchronous>, transform_indices = @transform_2, window_bounds = array<i64: 1, 128>}, {pipeline_mode = #tpu.pipeline_mode<synchronous>, transform_indices = @transform_3, window_bounds = array<i64: 128, 128>}, {pipeline_mode = #tpu.pipeline_mode<synchronous>, transform_indices = @transform_4, window_bounds = array<i64: 1, 128>}, {pipeline_mode = #tpu.pipeline_mode<synchronous>, transform_indices = @transform_5, window_bounds = array<i64: 128, 128>}, {pipeline_mode = #tpu.pipeline_mode<synchronous>, transform_indices = @transform_6, window_bounds = array<i64: 1, 128>}, {pipeline_mode = #tpu.pipeline_mode<synchronous>, transform_indices = @transform_7, window_bounds = array<i64: 1, 128>}, {pipeline_mode = #tpu.pipeline_mode<synchronous>, transform_indices = @transform_8, window_bounds = array<i64: 1, 128>}, {transform_indices = @transform_9, window_bounds = array<i64: 8, 4>}]} {
    %c0 = arith.constant 0 : index
    %c0_0 = arith.constant 0 : index
    %0 = vector.load %arg1[%c0, %c0_0] : memref<8x128xf32, #tpu.memory_space<vmem>>, vector<8x128xf32>
    %c0_1 = arith.constant 0 : index
    %c0_2 = arith.constant 0 : index
    %1 = vector.load %arg2[%c0_1, %c0_2] : memref<128x128xf32, #tpu.memory_space<vmem>>, vector<128x128xf32>
    %cst = arith.constant dense<0.000000e+00> : vector<8x128xf32>
    %2 = tpu.matmul %0, %1, %cst {dimension_numbers = #tpu.dot_dimension_numbers<[1], [0], [0], [1], [0, 0, 1, 1], [], []>} : vector<8x128xf32>, vector<128x128xf32>, vector<8x128xf32> -> vector<8x128xf32>
    %c0_3 = arith.constant 0 : index
    %c0_4 = arith.constant 0 : index
    %3 = vector.load %arg3[%c0_3, %c0_4] : memref<1x128xf32, #tpu.memory_space<vmem>>, vector<1x128xf32>
    %4 = vector.broadcast %3 : vector<1x128xf32> to vector<8x128xf32>
    %5 = arith.addf %2, %4 : vector<8x128xf32>
    %cst_5 = arith.constant 0.000000e+00 : f32
    %6 = vector.broadcast %cst_5 : f32 to vector<8x128xf32>
    %7 = arith.maximumf %5, %6 : vector<8x128xf32>
    %c0_6 = arith.constant 0 : index
    %c0_7 = arith.constant 0 : index
    %8 = vector.load %arg4[%c0_6, %c0_7] : memref<128x128xf32, #tpu.memory_space<vmem>>, vector<128x128xf32>
    %cst_8 = arith.constant dense<0.000000e+00> : vector<8x128xf32>
    %9 = tpu.matmul %7, %8, %cst_8 {dimension_numbers = #tpu.dot_dimension_numbers<[1], [0], [0], [1], [0, 0, 1, 1], [], []>} : vector<8x128xf32>, vector<128x128xf32>, vector<8x128xf32> -> vector<8x128xf32>
    %c0_9 = arith.constant 0 : index
    %c0_10 = arith.constant 0 : index
    %10 = vector.load %arg5[%c0_9, %c0_10] : memref<1x128xf32, #tpu.memory_space<vmem>>, vector<1x128xf32>
    %11 = vector.broadcast %10 : vector<1x128xf32> to vector<8x128xf32>
    %12 = arith.addf %9, %11 : vector<8x128xf32>
    %cst_11 = arith.constant 0.000000e+00 : f32
    %13 = vector.broadcast %cst_11 : f32 to vector<8x128xf32>
    %14 = arith.maximumf %12, %13 : vector<8x128xf32>
    %c0_12 = arith.constant 0 : index
    %c0_13 = arith.constant 0 : index
    %15 = vector.load %arg6[%c0_12, %c0_13] : memref<128x128xf32, #tpu.memory_space<vmem>>, vector<128x128xf32>
    %cst_14 = arith.constant dense<0.000000e+00> : vector<8x128xf32>
    %16 = tpu.matmul %14, %15, %cst_14 {dimension_numbers = #tpu.dot_dimension_numbers<[1], [0], [0], [1], [0, 0, 1, 1], [], []>} : vector<8x128xf32>, vector<128x128xf32>, vector<8x128xf32> -> vector<8x128xf32>
    %c0_15 = arith.constant 0 : index
    %c0_16 = arith.constant 0 : index
    %17 = vector.load %arg7[%c0_15, %c0_16] : memref<1x128xf32, #tpu.memory_space<vmem>>, vector<1x128xf32>
    %18 = vector.broadcast %17 : vector<1x128xf32> to vector<8x128xf32>
    %19 = arith.addf %16, %18 : vector<8x128xf32>
    %20 = math.tanh %19 : vector<8x128xf32>
    %c0_17 = arith.constant 0 : index
    %c0_18 = arith.constant 0 : index
    %21 = vector.load %arg8[%c0_17, %c0_18] : memref<1x128xf32, #tpu.memory_space<vmem>>, vector<1x128xf32>
    %22 = vector.broadcast %21 : vector<1x128xf32> to vector<8x128xf32>
    %23 = arith.mulf %20, %22 : vector<8x128xf32>
    %c0_19 = arith.constant 0 : index
    %c0_20 = arith.constant 0 : index
    %24 = vector.load %arg9[%c0_19, %c0_20] : memref<1x128xf32, #tpu.memory_space<vmem>>, vector<1x128xf32>
    %25 = vector.broadcast %24 : vector<1x128xf32> to vector<8x128xf32>
    %26 = arith.addf %23, %25 : vector<8x128xf32>
    %27 = vector.extract_strided_slice %26 {offsets = [0, 0], sizes = [8, 4], strides = [1, 1]} : vector<8x128xf32> to vector<8x4xf32>
    %c0_21 = arith.constant 0 : index
    %c0_22 = arith.constant 0 : index
    %28 = vector.load %arg10[%c0_21, %c0_22] : memref<8x4xf32, #tpu.memory_space<vmem>>, vector<8x4xf32>
    tpu.vector_store %arg10[%c0_21, %c0_22], %27 {strides = array<i32>} : memref<8x4xf32, #tpu.memory_space<vmem>>, vector<8x4xf32>,
    return
  }
  func.func @transform_0(%arg0: i32) -> (i32, i32) {
    %c0_i32 = arith.constant 0 : i32
    %c0_i32_0 = arith.constant 0 : i32
    return %arg0, %c0_i32 : i32, i32
  }
  func.func @transform_1(%arg0: i32) -> (i32, i32) {
    %c0_i32 = arith.constant 0 : i32
    %c0_i32_0 = arith.constant 0 : i32
    %c0_i32_1 = arith.constant 0 : i32
    return %c0_i32, %c0_i32_0 : i32, i32
  }
  func.func @transform_2(%arg0: i32) -> (i32, i32) {
    %c0_i32 = arith.constant 0 : i32
    %c0_i32_0 = arith.constant 0 : i32
    %c0_i32_1 = arith.constant 0 : i32
    return %c0_i32, %c0_i32_0 : i32, i32
  }
  func.func @transform_3(%arg0: i32) -> (i32, i32) {
    %c0_i32 = arith.constant 0 : i32
    %c0_i32_0 = arith.constant 0 : i32
    %c0_i32_1 = arith.constant 0 : i32
    return %c0_i32, %c0_i32_0 : i32, i32
  }
  func.func @transform_4(%arg0: i32) -> (i32, i32) {
    %c0_i32 = arith.constant 0 : i32
    %c0_i32_0 = arith.constant 0 : i32
    %c0_i32_1 = arith.constant 0 : i32
    return %c0_i32, %c0_i32_0 : i32, i32
  }
  func.func @transform_5(%arg0: i32) -> (i32, i32) {
    %c0_i32 = arith.constant 0 : i32
    %c0_i32_0 = arith.constant 0 : i32
    %c0_i32_1 = arith.constant 0 : i32
    return %c0_i32, %c0_i32_0 : i32, i32
  }
  func.func @transform_6(%arg0: i32) -> (i32, i32) {
    %c0_i32 = arith.constant 0 : i32
    %c0_i32_0 = arith.constant 0 : i32
    %c0_i32_1 = arith.constant 0 : i32
    return %c0_i32, %c0_i32_0 : i32, i32
  }
  func.func @transform_7(%arg0: i32) -> (i32, i32) {
    %c0_i32 = arith.constant 0 : i32
    %c0_i32_0 = arith.constant 0 : i32
    %c0_i32_1 = arith.constant 0 : i32
    return %c0_i32, %c0_i32_0 : i32, i32
  }
  func.func @transform_8(%arg0: i32) -> (i32, i32) {
    %c0_i32 = arith.constant 0 : i32
    %c0_i32_0 = arith.constant 0 : i32
    %c0_i32_1 = arith.constant 0 : i32
    return %c0_i32, %c0_i32_0 : i32, i32
  }
  func.func @transform_9(%arg0: i32) -> (i32, i32) {
    %c0_i32 = arith.constant 0 : i32
    %c0_i32_0 = arith.constant 0 : i32
    return %arg0, %c0_i32 : i32, i32
  }
}

</mosaic_0001>

<bundles_post_ra>
// kernel: _forward_impl.1
= control target key start
LH: loop header
LB: loop body
LE: loop exit
PB: predicated region body
PF: predicated region fallthrough
CT: control target
= control target key end

     0   :  { %14 = vsyncpa [#allocation3], 0  ;;  %s394_s0 = inlined_call_operand.vmem [shape: f32[8,128], index: 0, kind: input, shape index: {}]   ;;  %s395_s1 = inlined_call_operand.hbm [shape: f32[128,128], index: 1, kind: input, shape index: {}]   ;;  %s396_s2 = inlined_call_operand.vmem [shape: f32[1,128], index: 2, kind: input, shape index: {}]   ;;  %s397_s3 = inlined_call_operand.hbm [shape: f32[128,128], index: 3, kind: input, shape index: {}]   ;;  %s398_s4 = inlined_call_operand.vmem [shape: f32[1,128], index: 4, kind: input, shape index: {}]   ;;  %s399_s5 = inlined_call_operand.hbm [shape: f32[128,128], index: 5, kind: input, shape index: {}]   ;;  %s400_s6 = inlined_call_operand.vmem [shape: f32[1,128], index: 6, kind: input, shape index: {}]   ;;  %s401_s7 = inlined_call_operand.vmem [shape: f32[1,128], index: 7, kind: input, shape index: {}]   ;;  %s402_s8 = inlined_call_operand.vmem [shape: f32[1,128], index: 8, kind: input, shape index: {}]   ;;  %s403_s9 = inlined_call_operand.vmem [shape: f32[8,4], index: 9, kind: output, shape index: {}]  }
   0x1   :  { %15 = vsyncpa [#allocation5], 0  ;;  %s37_s11 = sshll.u32 %s397_s3, 4  ;;  %s309_s12 = smov [#allocation4]   ;;  %s38_s11 = int_to_ptr.hbm [resolvable:$true] %s37_s11 }
   0x2   :  { %s39_s13 = sshll.u32 %s309_s12, 4  ;;  %s22_s16 = sshll.u32 %s395_s1, 4  ;;  %s40_s13 = int_to_ptr.vmem [resolvable:$true] %s39_s13  ;;  %s23_s16 = int_to_ptr.hbm [resolvable:$true] %s22_s16 }
   0x3   :  { %s310_s17 = smov 128   ;;  %s311_s18 = smov 8  }
   0x4   :  { %45 = dma.hbm_to_vmem [thread:$0]  %s38_s11, 2048, %s40_s13, [#allocation5], %s310_s17, %s310_s17, %s311_s18  }
   0x5   :  { %s312_s19 = smov [#allocation2]   ;;  %s52_s23 = sshll.u32 %s399_s5, 4  ;;  %s53_s23 = int_to_ptr.hbm [resolvable:$true] %s52_s23 }
   0x6   :  { %s24_s20 = sshll.u32 %s312_s19, 4  ;;  %s313_s3 = smov [#allocation6]   ;;  %s25_s20 = int_to_ptr.vmem [resolvable:$true] %s24_s20 }
   0x7   :  { %30 = dma.hbm_to_vmem [thread:$0]  %s23_s16, 2048, %s25_s20, [#allocation3], %s310_s17, %s310_s17, %s311_s18  }
   0x8   :  { %s54_s24 = sshll.u32 %s313_s3, 4  ;;  %s55_s24 = int_to_ptr.vmem [resolvable:$true] %s54_s24 }
   0x9   :  { %60 = dma.hbm_to_vmem [thread:$0]  %s53_s23, 2048, %s55_s24, [#allocation5], %s310_s17, %s310_s17, %s311_s18  }
   0xa   :  { %305 = dma.done.wait [#allocation3], 2048  }
   0xb   :  { %306 = vsyncadd [#allocation3], 4294965248 }
   0xc   :  { %307 = dma.done.wait [#allocation5], 4096  }
   0xd   :  { %308 = vsyncadd [#allocation5], 4294963200  ;;  %v95_v0 = vld [vmem:[#allocation2 + $0x78] sm:$0xff]  ;;  %v94_v1 = vld [vmem:[#allocation2 + $0x70] sm:$0xff]  ;;  %vm213_vm0 = vcmask 31744  }
   0xe   :  { %100 = vmatpush.msra.mxu0 %v95_v0  ;;  %v93_v2 = vld [vmem:[#allocation2 + $0x68] sm:$0xff]  ;;  %v92_v3 = vld [vmem:[#allocation2 + $0x60] sm:$0xff]  ;;  %v136_v4 = vld [vmem:[#allocation4 + $0x78] sm:$0xff] }
   0xf   :  { %v91_v5 = vld [vmem:[#allocation2 + $0x58] sm:$0xff]  ;;  %141 = vmatpush.msra.mxu1 %v136_v4  ;;  %v135_v6 = vld [vmem:[#allocation4 + $0x70] sm:$0xff]  ;;  %v134_v7 = vld [vmem:[#allocation4 + $0x68] sm:$0xff] }
  0x10   :  { %101 = vmatpush.msra.mxu0 %v94_v1  ;;  %v90_v8 = vld [vmem:[#allocation2 + $0x50] sm:$0xff]  ;;  %v89_v9 = vld [vmem:[#allocation2 + $0x48] sm:$0xff]  ;;  %v133_v10 = vld [vmem:[#allocation4 + $0x60] sm:$0xff] }
  0x11   :  { %142 = vmatpush.msra.mxu1 %v135_v6  ;;  %v132_v11 = vld [vmem:[#allocation4 + $0x58] sm:$0xff]  ;;  %v88_v12 = vld [vmem:[#allocation2 + $0x40] sm:$0xff]  ;;  %v131_v13 = vld [vmem:[#allocation4 + $0x50] sm:$0xff] }
  0x12   :  { %102 = vmatpush.msra.mxu0 %v93_v2  ;;  %v87_v14 = vld [vmem:[#allocation2 + $0x38] sm:$0xff]  ;;  %v130_v15 = vld [vmem:[#allocation4 + $0x48] sm:$0xff]  ;;  %v86_v16 = vld [vmem:[#allocation2 + $0x30] sm:$0xff] }
  0x13   :  { %143 = vmatpush.msra.mxu1 %v134_v7  ;;  %v129_v17 = vld [vmem:[#allocation4 + $0x40] sm:$0xff]  ;;  %v85_v18 = vld [vmem:[#allocation2 + $0x28] sm:$0xff]  ;;  %v128_v19 = vld [vmem:[#allocation4 + $0x38] sm:$0xff] }
  0x14   :  { %103 = vmatpush.msra.mxu0 %v92_v3  ;;  %v84_v20 = vld [vmem:[#allocation2 + $0x20] sm:$0xff]  ;;  %v127_v21 = vld [vmem:[#allocation4 + $0x30] sm:$0xff]  ;;  %v83_v22 = vld [vmem:[#allocation2 + $0x18] sm:$0xff] }
  0x15   :  { %144 = vmatpush.msra.mxu1 %v133_v10  ;;  %v126_v23 = vld [vmem:[#allocation4 + $0x28] sm:$0xff]  ;;  %v82_v24 = vld [vmem:[#allocation2 + $0x10] sm:$0xff]  ;;  %v125_v25 = vld [vmem:[#allocation4 + $0x20] sm:$0xff] }
  0x16   :  { %104 = vmatpush.msra.mxu0 %v91_v5  ;;  %v81_v26 = vld [vmem:[#allocation2 + $0x8] sm:$0xff]  ;;  %v124_v27 = vld [vmem:[#allocation4 + $0x18] sm:$0xff]  ;;  %v80_v28 = vld [vmem:[#allocation2] sm:$0xff] }
  0x17   :  { %145 = vmatpush.msra.mxu1 %v132_v11  ;;  %v79_v29 = vld [vmem:[%s394_s0] sm:$0xff]  ;;  %v123_v30 = vld [vmem:[#allocation4 + $0x10] sm:$0xff]  ;;  %v122_v31 = vld [vmem:[#allocation4 + $0x8] sm:$0xff] }
  0x18   :  { %105 = vmatpush.msra.mxu0 %v90_v8  ;;  %v121_v32 = vld [vmem:[#allocation4] sm:$0xff]  ;;  %v177_v33 = vld [vmem:[#allocation6 + $0x78] sm:$0xff]  ;;  %v176_v34 = vld [vmem:[#allocation6 + $0x70] sm:$0xff] }
  0x19   :  { %146 = vmatpush.msra.mxu1 %v131_v13  ;;  %182 = vmatpush.msra.mxu2 %v177_v33  ;;  %v175_v35 = vld [vmem:[#allocation6 + $0x68] sm:$0xff]  ;;  %v174_v36 = vld [vmem:[#allocation6 + $0x60] sm:$0xff]  ;;  %v173_v37 = vld [vmem:[#allocation6 + $0x58] sm:$0xff] }
  0x1a   :  { %106 = vmatpush.msra.mxu0 %v89_v9  ;;  %v172_v38 = vld [vmem:[#allocation6 + $0x50] sm:$0xff]  ;;  %v171_v39 = vld [vmem:[#allocation6 + $0x48] sm:$0xff]  ;;  %v170_v40 = vld [vmem:[#allocation6 + $0x40] sm:$0xff] }
  0x1b   :  { %147 = vmatpush.msra.mxu1 %v130_v15  ;;  %183 = vmatpush.msra.mxu2 %v176_v34  ;;  %v169_v41 = vld [vmem:[#allocation6 + $0x38] sm:$0xff]  ;;  %v168_v42 = vld [vmem:[#allocation6 + $0x30] sm:$0xff]  ;;  %v167_v43 = vld [vmem:[#allocation6 + $0x28] sm:$0xff] }
  0x1c   :  { %107 = vmatpush.msra.mxu0 %v88_v12  ;;  %v166_v44 = vld [vmem:[#allocation6 + $0x20] sm:$0xff]  ;;  %v165_v45 = vld [vmem:[#allocation6 + $0x18] sm:$0xff]  ;;  %v164_v50 = vld [vmem:[#allocation6 + $0x10] sm:$0xff] }
  0x1d   :  { %148 = vmatpush.msra.mxu1 %v129_v17  ;;  %184 = vmatpush.msra.mxu2 %v175_v35  ;;  %v226_v46 = vld [vmem:[%s396_s2] ss:$0 sm:$0xff]  ;;  %v163_v51 = vld [vmem:[#allocation6 + $0x8] sm:$0xff] }
  0x1e   :  { %108 = vmatpush.msra.mxu0 %v87_v14  ;;  %v162_v52 = vld [vmem:[#allocation6] sm:$0xff] }
  0x1f   :  { %149 = vmatpush.msra.mxu1 %v128_v19  ;;  %185 = vmatpush.msra.mxu2 %v174_v36  ;;  %v227_v53 = vld [vmem:[%s398_s4] ss:$0 sm:$0xff] }
  0x20   :  { %109 = vmatpush.msra.mxu0 %v86_v16  ;;  %v228_v57 = vld [vmem:[%s400_s6] ss:$0 sm:$0xff] }
  0x21   :  { %150 = vmatpush.msra.mxu1 %v127_v21  ;;  %186 = vmatpush.msra.mxu2 %v173_v37  ;;  %v229_v60 = vld [vmem:[%s401_s7] ss:$0 sm:$0xff] }
  0x22   :  { %110 = vmatpush.msra.mxu0 %v85_v18  ;;  %v230_v61 = vld [vmem:[%s402_s8] ss:$0 sm:$0xff] }
  0x23   :  { %151 = vmatpush.msra.mxu1 %v126_v23  ;;  %187 = vmatpush.msra.mxu2 %v172_v38 }
  0x24   :  { %111 = vmatpush.msra.mxu0 %v84_v20 }
  0x25   :  { %152 = vmatpush.msra.mxu1 %v125_v25  ;;  %188 = vmatpush.msra.mxu2 %v171_v39 }
  0x26   :  { %112 = vmatpush.msra.mxu0 %v83_v22 }
  0x27   :  { %153 = vmatpush.msra.mxu1 %v124_v27  ;;  %189 = vmatpush.msra.mxu2 %v170_v40 }
  0x28   :  { %113 = vmatpush.msra.mxu0 %v82_v24 }
  0x29   :  { %154 = vmatpush.msra.mxu1 %v123_v30  ;;  %190 = vmatpush.msra.mxu2 %v169_v41 }
  0x2a   :  { %114 = vmatpush.msra.mxu0 %v81_v26 }
  0x2b   :  { %155 = vmatpush.msra.mxu1 %v122_v31  ;;  %191 = vmatpush.msra.mxu2 %v168_v42 }
  0x2c   :  { %115 = vmatpush.msra.mxu0 %v80_v28 }
  0x2d   :  { %116 = vmatmul.f32.vlgmr.msra.gmra.mxu0 %v79_v29  ;;  %156 = vmatpush.msra.mxu1 %v121_v32 }
  0x2e   :  { %192 = vmatpush.msra.mxu2 %v167_v43 }
  0x30   :  { %193 = vmatpush.msra.mxu2 %v166_v44 }
  0x32   :  { %194 = vmatpush.msra.mxu2 %v165_v45 }
  0x34   :  { %195 = vmatpush.msra.mxu2 %v164_v50 }
  0x36   :  { %196 = vmatpush.msra.mxu2 %v163_v51 }
  0x38   :  { %197 = vmatpush.msra.mxu2 %v162_v52 }
  0xaa   :  { %v117_v47 = vpop.f32.mrf.mxu0 }
  0xab   :  { %v118_v48 = vadd.f32 %v226_v46, %v117_v47 }
  0xad   :  { %v120_v49 = vmax.f32 %v118_v48, 0.0 }
  0xaf   :  { %157 = vmatmul.f32.vlgmr.msra.gmra.mxu1 %v120_v49 }
 0x12c   :  { %v158_v54 = vpop.f32.mrf.mxu1 }
 0x12d   :  { %v159_v55 = vadd.f32 %v227_v53, %v158_v54 }
 0x12f   :  { %v161_v56 = vmax.f32 %v159_v55, 0.0 }
 0x131   :  { %198 = vmatmul.f32.vlgmr.msra.gmra.mxu2 %v161_v56 }
 0x1b4   :  { %v199_v58 = vpop.f32.mrf.mxu2 }
 0x1b5   :  { %v200_v59 = vadd.f32 %v228_v57, %v199_v58 }
 0x1b7   :  { %231 = vtanh.f32 %v200_v59 }
 0x1bd   :  { %v232_v62 = vpop.eup %231 }
 0x1be   :  { %v207_v63 = vmul.f32 %v232_v62, %v229_v60 }
 0x1c0   :  { %v212_v0 = vadd.f32 %v230_v61, %v207_v63 }
 0x1c2   :  { %214 = vst.msk [vmem:[%s403_s9] sm:$0xff] %vm213_vm0, %v212_v0 }
 0x1c3   :  { %219 = vsyncpa [#allocation3], 1 }
 0x1c4   :  { %220 = vsyncpa [#allocation5], 1 }

</bundles_post_ra>
